<compile_context>
chip_gen: v5e
topology: v5e:2x2
jax: 0.10.0
libtpu: 0.0.40
codegen_flags: <defaults>
</compile_context>

<pallas_src>
import functools

import jax
import jax.numpy as jnp
from jax import lax
from jax.experimental import pallas as pl
from jax.experimental.pallas import tpu as pltpu

EPS = 1e-10
_LANE = 128


# ---------------------------------------------------------------------------
# Kernels
# ---------------------------------------------------------------------------
def _kl_map_kernel(p_ref, y_ref, o_ref, *, num_ch):
    """Per-pixel KL map: o[r, l] = sum_c y*(log(y+eps)-log(p+eps))."""
    # p_ref, y_ref: (1, C, TR, 128); o_ref: (1, TR, 128).
    acc = None
    for c in range(num_ch):                      # static unroll over channels
        p_c = p_ref[0, c].astype(jnp.float32)
        y_c = y_ref[0, c].astype(jnp.float32)
        term = y_c * (jnp.log(y_c + EPS) - jnp.log(p_c + EPS))
        acc = term if acc is None else acc + term
    o_ref[0] = acc.astype(o_ref.dtype)


def _kl_sum_kernel(p_ref, y_ref, o_ref, *, num_ch, tile_rows, total_rows, need_mask):
    """Fused reduce=True: accumulate per-batch partial sums in a resident f32 block."""
    t = pl.program_id(1)

    @pl.when(t == 0)
    def _init():
        o_ref[...] = jnp.zeros_like(o_ref)

    acc = None
    for c in range(num_ch):
        p_c = p_ref[0, c].astype(jnp.float32)
        y_c = y_ref[0, c].astype(jnp.float32)
        term = y_c * (jnp.log(y_c + EPS) - jnp.log(p_c + EPS))
        acc = term if acc is None else acc + term

    if need_mask:
        # Tail block reads unspecified rows (no row padding in HBM); zero them
        # so NaN/Inf from log(garbage) never reaches the accumulator.
        row0 = t * tile_rows
        rid = row0 + lax.broadcasted_iota(jnp.int32, acc.shape, 0)
        acc = jnp.where(rid < total_rows, acc, 0.0)

    o_ref[0] = o_ref[0] + acc


# ---------------------------------------------------------------------------
# Wrapper
# ---------------------------------------------------------------------------
def _vmem_capacity_bytes() -> int:
    try:
        return int(pltpu.get_tpu_info().vmem_capacity_bytes)
    except Exception:
        return 64 << 20            # conservative (v7x per-TensorCore)


def _sublane_pack(itemsize: int) -> int:
    # f32 -> 8, bf16 -> 16, int8/fp8 -> 32 (native packed sublane tile).
    return 8 * max(1, 4 // itemsize)


def _choose_tile_rows(rows: int, C: int, itemsize: int, target_bytes: int, sub: int) -> int:
    """Pick a spatial tile (in 128-lane rows) near the per-chip target block size."""
    max_rows = max(1, target_bytes // (C * _LANE * itemsize))
    if max_rows >= rows:
        return rows                               # full extent (exempt from /8 rule)
    return max(sub, (max_rows // sub) * sub)      # packed-sublane aligned tile


def kl_divergence_2d(p_prob: jax.Array, y_prob: jax.Array,
                     reduce: bool = False, tile_rows: int | None = None) -> jax.Array:
    """Pallas equivalent of KL_Divergence_2D.forward.

    p_prob, y_prob: (N, C, H, W) probabilities along the channel dim.
    Returns (N, H, W) if reduce=False, scalar mean otherwise.
    """
    # TODO(synk): the PyTorch module asserts simplex(p, 1); input validation is
    # not replicated in-kernel.
    assert p_prob.shape == y_prob.shape
    N, C, H, W = p_prob.shape
    S = H * W
    itemsize = jnp.dtype(p_prob.dtype).itemsize
    out_dtype = p_prob.dtype

    rows = pl.cdiv(S, _LANE)
    S_pad = rows * _LANE

    vmem_cap = _vmem_capacity_bytes()
    # ~6 MiB input blocks on 128 MiB VMEM parts (v5e/v6e), ~2 MiB on 64 MiB (v7x).
    target_in_block = (6 << 20) if vmem_cap >= (96 << 20) else (2 << 20)
    sub = _sublane_pack(itemsize)

    if tile_rows is None:
        tile_rows = _choose_tile_rows(rows, C, itemsize, target_in_block, sub)
        # v7x megacore: with N == 1 make sure there are >= 2 parallel grid steps.
        if N == 1 and tile_rows >= rows and rows >= 2 * sub:
            tile_rows = max(sub, ((rows // 2) // sub) * sub)
    n_tiles = pl.cdiv(rows, tile_rows)

    # Lane-dense packing (N, C, S) -> (N, C, rows, 128).  Zero lane padding only
    # when S is not already a multiple of 128; zeros contribute exactly 0.
    p3 = p_prob.reshape(N, C, S)
    y3 = y_prob.reshape(N, C, S)
    if S_pad != S:
        p3 = jnp.pad(p3, ((0, 0), (0, 0), (0, S_pad - S)))
        y3 = jnp.pad(y3, ((0, 0), (0, 0), (0, S_pad - S)))
    p4 = p3.reshape(N, C, rows, _LANE)
    y4 = y3.reshape(N, C, rows, _LANE)

    # VMEM budget: 2 inputs x 2 pipeline buffers + double-buffered output +
    # in-kernel f32 temporaries (accumulator + a few per-channel chunks) + headroom.
    in_block = C * tile_rows * _LANE * itemsize
    out_block = tile_rows * _LANE * (4 if reduce else jnp.dtype(out_dtype).itemsize)
    f32_tmp = 4 * tile_rows * _LANE * 4
    needed = 4 * in_block + 2 * out_block + f32_tmp
    vmem_limit = int(min(max(needed + (4 << 20), 8 << 20), (vmem_cap * 3) // 4))

    in_specs = [
        pl.BlockSpec((1, C, tile_rows, _LANE), lambda i, t: (i, 0, t, 0)),
        pl.BlockSpec((1, C, tile_rows, _LANE), lambda i, t: (i, 0, t, 0)),
    ]

    if reduce:
        kern = functools.partial(
            _kl_sum_kernel, num_ch=C, tile_rows=tile_rows, total_rows=rows,
            need_mask=(rows % tile_rows != 0))
        partial = pl.pallas_call(
            kern,
            out_shape=jax.ShapeDtypeStruct((N, tile_rows, _LANE), jnp.float32),
            grid=(N, n_tiles),
            in_specs=in_specs,
            out_specs=pl.BlockSpec((1, tile_rows, _LANE), lambda i, t: (i, 0, 0)),
            compiler_params=pltpu.CompilerParams(
                dimension_semantics=("parallel", "arbitrary"),
                vmem_limit_bytes=vmem_limit,
            ),
        )(p4, y4)
        return jnp.sum(partial) / (N * S)

    kern = functools.partial(_kl_map_kernel, num_ch=C)
    out = pl.pallas_call(
        kern,
        out_shape=jax.ShapeDtypeStruct((N, rows, _LANE), out_dtype),
        grid=(N, n_tiles),
        in_specs=in_specs,
        out_specs=pl.BlockSpec((1, tile_rows, _LANE), lambda i, t: (i, t, 0)),
        compiler_params=pltpu.CompilerParams(
            dimension_semantics=("parallel", "parallel"),
            vmem_limit_bytes=vmem_limit,
        ),
    )(p4, y4)

    if S_pad != S:
        return out.reshape(N, S_pad)[:, :S].reshape(N, H, W)
    return out.reshape(N, H, W)


# ---------------------------------------------------------------------------
# Reference & demo
# ---------------------------------------------------------------------------
def _reference(p_prob, y_prob, reduce=False):
    logp = jnp.log(p_prob + EPS)
    logy = jnp.log(y_prob + EPS)
    res = jnp.sum(y_prob * logy, axis=1) - jnp.sum(y_prob * logp, axis=1)
    return jnp.mean(res) if reduce else res


def _make_probs(key, shape):
    k1, k2 = jax.random.split(key)
    p = jax.nn.softmax(jax.random.normal(k1, shape, jnp.float32), axis=1)
    y = jax.nn.softmax(jax.random.normal(k2, shape, jnp.float32), axis=1)
    return p, y


if __name__ == "__main__":
    key = jax.random.PRNGKey(0)
    k1, k2, k3 = jax.random.split(key, 3)

    # --- main demo shape: (N, C, H, W) = (2, 4, 16, 16) ---------------------
    N, C, H, W = 2, 4, 16, 16
    p_prob, y_prob = _make_probs(k1, (N, C, H, W))

    out = jax.block_until_ready(kl_divergence_2d(p_prob, y_prob, reduce=False))
    ref = _reference(p_prob, y_prob, reduce=False)
    assert out.shape == (N, H, W)
    assert jnp.allclose(out, ref, atol=1e-5, rtol=1e-5)

    out_r = jax.block_until_ready(kl_divergence_2d(p_prob, y_prob, reduce=True))
    assert jnp.allclose(out_r, _reference(p_prob, y_prob, reduce=True),
                        atol=1e-5, rtol=1e-5)

    # --- multi-tile + partial final block path (no row padding in HBM) ------
    # S = 48*48 = 2304 -> rows = 18, forced tile_rows = 8 -> grid=(N, 3) with a
    # ragged final block; exercises masked output writes and the reduce mask.
    H2 = W2 = 48
    p2, y2 = _make_probs(k2, (N, C, H2, W2))
    out2 = jax.block_until_ready(kl_divergence_2d(p2, y2, tile_rows=8))
    assert jnp.allclose(out2, _reference(p2, y2), atol=1e-5, rtol=1e-5)
    out2_r = jax.block_until_ready(kl_divergence_2d(p2, y2, reduce=True, tile_rows=8))
    assert jnp.allclose(out2_r, _reference(p2, y2, reduce=True), atol=1e-5, rtol=1e-5)

    # --- lane-padding path (S % 128 != 0) ------------------------------------
    H3 = W3 = 20
    p3, y3 = _make_probs(k3, (N, 3, H3, W3))
    out3 = jax.block_until_ready(kl_divergence_2d(p3, y3))
    assert jnp.allclose(out3, _reference(p3, y3), atol=1e-5, rtol=1e-5)

    print("KERNEL_OK")
</pallas_src>

<mosaic_0001>
module attributes {stable_mosaic.version = 11 : i64} {
  func.func @_kl_map_kernel(%arg0: i32, %arg1: i32, %arg2: memref<1x4x2x128xf32, #tpu.memory_space<vmem>>, %arg3: memref<1x4x2x128xf32, #tpu.memory_space<vmem>>, %arg4: memref<1x2x128xf32, #tpu.memory_space<vmem>>) attributes {dimension_semantics = [#tpu.dimension_semantics<parallel>, #tpu.dimension_semantics<parallel>], iteration_bounds = array<i64: 2, 1>, scalar_prefetch = 0 : i64, scratch_operands = 0 : i64, tpu.core_type = #tpu.core_type<tc>, window_params = [{transform_indices = @transform_0, window_bounds = array<i64: 1, 4, 2, 128>}, {transform_indices = @transform_1, window_bounds = array<i64: 1, 4, 2, 128>}, {transform_indices = @transform_2, window_bounds = array<i64: 1, 2, 128>}]} {
    %c0 = arith.constant 0 : index
    %c0_0 = arith.constant 0 : index
    %c0_1 = arith.constant 0 : index
    %c0_2 = arith.constant 0 : index
    %0 = vector.load %arg2[%c0, %c0_0, %c0_1, %c0_2] : memref<1x4x2x128xf32, #tpu.memory_space<vmem>>, vector<1x1x2x128xf32>
    %1 = vector.shape_cast %0 : vector<1x1x2x128xf32> to vector<2x128xf32>
    %c0_3 = arith.constant 0 : index
    %c0_4 = arith.constant 0 : index
    %c0_5 = arith.constant 0 : index
    %c0_6 = arith.constant 0 : index
    %2 = vector.load %arg3[%c0_3, %c0_4, %c0_5, %c0_6] : memref<1x4x2x128xf32, #tpu.memory_space<vmem>>, vector<1x1x2x128xf32>
    %3 = vector.shape_cast %2 : vector<1x1x2x128xf32> to vector<2x128xf32>
    %cst = arith.constant 1.000000e-10 : f32
    %4 = vector.broadcast %cst : f32 to vector<2x128xf32>
    %5 = arith.addf %3, %4 : vector<2x128xf32>
    %6 = math.log %5 : vector<2x128xf32>
    %cst_7 = arith.constant 1.000000e-10 : f32
    %7 = vector.broadcast %cst_7 : f32 to vector<2x128xf32>
    %8 = arith.addf %1, %7 : vector<2x128xf32>
    %9 = math.log %8 : vector<2x128xf32>
    %10 = arith.subf %6, %9 : vector<2x128xf32>
    %11 = arith.mulf %3, %10 : vector<2x128xf32>
    %c0_8 = arith.constant 0 : index
    %c1 = arith.constant 1 : index
    %c0_9 = arith.constant 0 : index
    %c0_10 = arith.constant 0 : index
    %12 = vector.load %arg2[%c0_8, %c1, %c0_9, %c0_10] : memref<1x4x2x128xf32, #tpu.memory_space<vmem>>, vector<1x1x2x128xf32>
    %13 = vector.shape_cast %12 : vector<1x1x2x128xf32> to vector<2x128xf32>
    %c0_11 = arith.constant 0 : index
    %c1_12 = arith.constant 1 : index
    %c0_13 = arith.constant 0 : index
    %c0_14 = arith.constant 0 : index
    %14 = vector.load %arg3[%c0_11, %c1_12, %c0_13, %c0_14] : memref<1x4x2x128xf32, #tpu.memory_space<vmem>>, vector<1x1x2x128xf32>
    %15 = vector.shape_cast %14 : vector<1x1x2x128xf32> to vector<2x128xf32>
    %cst_15 = arith.constant 1.000000e-10 : f32
    %16 = vector.broadcast %cst_15 : f32 to vector<2x128xf32>
    %17 = arith.addf %15, %16 : vector<2x128xf32>
    %18 = math.log %17 : vector<2x128xf32>
    %cst_16 = arith.constant 1.000000e-10 : f32
    %19 = vector.broadcast %cst_16 : f32 to vector<2x128xf32>
    %20 = arith.addf %13, %19 : vector<2x128xf32>
    %21 = math.log %20 : vector<2x128xf32>
    %22 = arith.subf %18, %21 : vector<2x128xf32>
    %23 = arith.mulf %15, %22 : vector<2x128xf32>
    %24 = arith.addf %11, %23 : vector<2x128xf32>
    %c0_17 = arith.constant 0 : index
    %c2 = arith.constant 2 : index
    %c0_18 = arith.constant 0 : index
    %c0_19 = arith.constant 0 : index
    %25 = vector.load %arg2[%c0_17, %c2, %c0_18, %c0_19] : memref<1x4x2x128xf32, #tpu.memory_space<vmem>>, vector<1x1x2x128xf32>
    %26 = vector.shape_cast %25 : vector<1x1x2x128xf32> to vector<2x128xf32>
    %c0_20 = arith.constant 0 : index
    %c2_21 = arith.constant 2 : index
    %c0_22 = arith.constant 0 : index
    %c0_23 = arith.constant 0 : index
    %27 = vector.load %arg3[%c0_20, %c2_21, %c0_22, %c0_23] : memref<1x4x2x128xf32, #tpu.memory_space<vmem>>, vector<1x1x2x128xf32>
    %28 = vector.shape_cast %27 : vector<1x1x2x128xf32> to vector<2x128xf32>
    %cst_24 = arith.constant 1.000000e-10 : f32
    %29 = vector.broadcast %cst_24 : f32 to vector<2x128xf32>
    %30 = arith.addf %28, %29 : vector<2x128xf32>
    %31 = math.log %30 : vector<2x128xf32>
    %cst_25 = arith.constant 1.000000e-10 : f32
    %32 = vector.broadcast %cst_25 : f32 to vector<2x128xf32>
    %33 = arith.addf %26, %32 : vector<2x128xf32>
    %34 = math.log %33 : vector<2x128xf32>
    %35 = arith.subf %31, %34 : vector<2x128xf32>
    %36 = arith.mulf %28, %35 : vector<2x128xf32>
    %37 = arith.addf %24, %36 : vector<2x128xf32>
    %c0_26 = arith.constant 0 : index
    %c3 = arith.constant 3 : index
    %c0_27 = arith.constant 0 : index
    %c0_28 = arith.constant 0 : index
    %38 = vector.load %arg2[%c0_26, %c3, %c0_27, %c0_28] : memref<1x4x2x128xf32, #tpu.memory_space<vmem>>, vector<1x1x2x128xf32>
    %39 = vector.shape_cast %38 : vector<1x1x2x128xf32> to vector<2x128xf32>
    %c0_29 = arith.constant 0 : index
    %c3_30 = arith.constant 3 : index
    %c0_31 = arith.constant 0 : index
    %c0_32 = arith.constant 0 : index
    %40 = vector.load %arg3[%c0_29, %c3_30, %c0_31, %c0_32] : memref<1x4x2x128xf32, #tpu.memory_space<vmem>>, vector<1x1x2x128xf32>
    %41 = vector.shape_cast %40 : vector<1x1x2x128xf32> to vector<2x128xf32>
    %cst_33 = arith.constant 1.000000e-10 : f32
    %42 = vector.broadcast %cst_33 : f32 to vector<2x128xf32>
    %43 = arith.addf %41, %42 : vector<2x128xf32>
    %44 = math.log %43 : vector<2x128xf32>
    %cst_34 = arith.constant 1.000000e-10 : f32
    %45 = vector.broadcast %cst_34 : f32 to vector<2x128xf32>
    %46 = arith.addf %39, %45 : vector<2x128xf32>
    %47 = math.log %46 : vector<2x128xf32>
    %48 = arith.subf %44, %47 : vector<2x128xf32>
    %49 = arith.mulf %41, %48 : vector<2x128xf32>
    %50 = arith.addf %37, %49 : vector<2x128xf32>
    %c0_35 = arith.constant 0 : index
    %c0_36 = arith.constant 0 : index
    %c0_37 = arith.constant 0 : index
    %51 = vector.load %arg4[%c0_35, %c0_36, %c0_37] : memref<1x2x128xf32, #tpu.memory_space<vmem>>, vector<1x2x128xf32>
    %52 = vector.shape_cast %51 : vector<1x2x128xf32> to vector<2x128xf32>
    %53 = vector.shape_cast %50 : vector<2x128xf32> to vector<1x2x128xf32>
    tpu.vector_store %arg4[%c0_35, %c0_36, %c0_37], %53 {strides = array<i32>} : memref<1x2x128xf32, #tpu.memory_space<vmem>>, vector<1x2x128xf32>,
    return
  }
  func.func @transform_0(%arg0: i32, %arg1: i32) -> (i32, i32, i32, i32) {
    %c0_i32 = arith.constant 0 : i32
    %c0_i32_0 = arith.constant 0 : i32
    %c0_i32_1 = arith.constant 0 : i32
    return %arg0, %c0_i32, %arg1, %c0_i32_0 : i32, i32, i32, i32
  }
  func.func @transform_1(%arg0: i32, %arg1: i32) -> (i32, i32, i32, i32) {
    %c0_i32 = arith.constant 0 : i32
    %c0_i32_0 = arith.constant 0 : i32
    %c0_i32_1 = arith.constant 0 : i32
    return %arg0, %c0_i32, %arg1, %c0_i32_0 : i32, i32, i32, i32
  }
  func.func @transform_2(%arg0: i32, %arg1: i32) -> (i32, i32, i32) {
    %c0_i32 = arith.constant 0 : i32
    %c0_i32_0 = arith.constant 0 : i32
    return %arg0, %arg1, %c0_i32 : i32, i32, i32
  }
}

</mosaic_0001>

<bundles_post_ra>
// kernel: tpu_custom_call.1
= control target key start
LH: loop header
LB: loop body
LE: loop exit
PB: predicated region body
PF: predicated region fallthrough
CT: control target
= control target key end

     0   :  { %7 = vsyncpa [#allocation3], 0  ;;  %s817_s0 = inlined_call_operand.hbm [shape: f32[2,4,2,128], index: 0, kind: input, shape index: {}]   ;;  %s818_s1 = inlined_call_operand.hbm [shape: f32[2,4,2,128], index: 1, kind: input, shape index: {}]   ;;  %s819_s2 = inlined_call_operand.hbm [shape: f32[2,2,128], index: 2, kind: output, shape index: {}]  }
   0x1   :  { %9 = vsyncpa [#allocation3 + $0x1], 0 }
   0x2   :  { %10 = vsyncpa [#allocation6], 0 }
   0x3   :  { %12 = vsyncpa [#allocation6 + $0x1], 0 }
   0x4   :  { %13 = vsyncpa [#allocation4], 0 }
   0x5   :  { %15 = vsyncpa [#allocation4 + $0x1], 0  ;;  %s675_s9 = smov 0   ;;  %s677_s10 = smov 0  }
   0x6   :  { %s679_s11 = smov 0   ;;  %s681_s12 = smov 0  }
   0x7   :  { %s683_s13 = smov 0   ;;  %s685_s14 = smov 0  }
   0x8 LB: > { %s399_s15 = sadd.s32 4294967295, %s656_s14   ;;  %s400_s16 = sadd.s32 4294967294, %s656_s14   ;;  %s656_s14 = sphi %s685_s14, %s21_s14   ;;  %s652_s13 = sphi %s683_s13, %s829_s13   ;;  %s648_s12 = sphi %s681_s12, %s828_s12   ;;  %s644_s11 = sphi %s679_s11, %s827_s11   ;;  %s640_s10 = sphi %s677_s10, %s826_s10   ;;  %s636_s9 = sphi %s675_s9, %s825_s9  }
   0x9   : > { %s33_s17 = sadd.s32 1, %s652_s13  ;;  %s42_s18 = sadd.s32 1, %s644_s11 }
   0xa   : > { %p35_p0 = scmp.ge.s32.totalorder %s33_s17, 2  ;;  %p49_p1 = scmp.ne.s32.totalorder %s644_s11, %s640_s10 }
   0xb   : > { %p50_p2 = scmp.eq.s32.totalorder %s656_s14, 0  ;;  %p55_p3 = scmp.ne.s32.totalorder %s640_s10, %s636_s9 }
   0xc   : > { %s831_s17 = smov (%p35_p0, %s33_s17), 0  ;;  %p56_p5 = scmp.eq.s32.totalorder %s399_s15, 0 }
   0xd   : > { %p716_p4 = por %p50_p2, %p49_p1  ;;  %s37_s20 = ssub.s32 %s652_s13, %s831_s17 }
   0xe   : > { %p109_p6 = scmp.eq.s32.totalorder %s399_s15, 1  ;;  %p40_p7 = scmp.eq.s32.totalorder %s37_s20, 0 }
   0xf   : > { %p722_p8 = por %p56_p5, %p55_p3  ;;  %p115_p10 = scmp.eq.s32.totalorder %s400_s16, 1 }
  0x10   : > { %p726_p9 = por %p109_p6, %p49_p1  ;;  %p402_p12 = scmp.ge.s32.totalorder %s656_s14, 2 }
  0x11   : > { %s731_s23 = scalar_select %p40_p7, %s644_s11, %s42_s18  }
  0x12   : > { %p733_p11 = por %p115_p10, %p55_p3  ;;  %p442_p13 = scmp.lt.s32.totalorder %s656_s14, 2 }
  0x13   : > { %s740_s25 = sand.u32 1, %s644_s11   ;;  %s423_s27 = sshll.u32 %s652_s13, 3 }
  0x14   : > { %s403_s26 = sshll.u32 %s740_s25, 3  ;;  %s145_s30 = scalar_lea.hbm %s817_s0, %s423_s27 }
  0x15   : > { %s139_s3 = scalar_lea.vmem [#allocation2], %s403_s26  ;;  %s146_s5 = sshll.u32 %s145_s30, 4  ;;  %s147_s5 = int_to_ptr.hbm [resolvable:$true] %s146_s5 }
  0x16   : > { %s148_s4 = sshll.u32 %s139_s3, 4  ;;  %p749_p0 = pnand %p442_p13, %p716_p4  ;;  %s149_s4 = int_to_ptr.vmem [resolvable:$true] %s148_s4 }
  0x17   : > { %p409_p1 = scmp.ge.s32.totalorder %s656_s14, 1  ;;  %s136_s7 = scalar_lea.sflag [#allocation3], %s740_s25 }
  0x18   : > { %s658_s8 = smov 32   ;;  %s659_s15 = smov 2  }
  0x19   : > { %434 = dma.hbm_to_vmem [thread:$0]  (!%p749_p0), %s147_s5, 128, %s149_s4, %s136_s7, %s658_s8, %s658_s8, %s659_s15  }
  0x1a   : > { %p179_p2 = scmp.lt.s32.totalorder %s656_s14, 3  ;;  %s168_s20 = scalar_lea.hbm %s818_s1, %s423_s27 }
  0x1b   : > { %s169_s28 = sshll.u32 %s168_s20, 4  ;;  %s162_s19 = scalar_lea.vmem [#allocation5], %s403_s26  ;;  %s170_s28 = int_to_ptr.hbm [resolvable:$true] %s169_s28 }
  0x1c   : > { %p180_p3 = pnand %p409_p1, %p179_p2  ;;  %s171_s29 = sshll.u32 %s162_s19, 4  ;;  %s172_s29 = int_to_ptr.vmem [resolvable:$true] %s171_s29 }
  0x1d   : > { %s159_s30 = scalar_lea.sflag [#allocation6], %s740_s25  ;;  %s765_s3 = sand.u32 (!%p180_p3), 1, %s640_s10  }
  0x1e   : > { %437 = dma.hbm_to_vmem [thread:$0]  (!%p749_p0), %s170_s28, 128, %s172_s29, %s159_s30, %s658_s8, %s658_s8, %s659_s15  }
  0x1f   : > { %183 = sbr.rel (%p180_p3) target bundleno = 67 (0x43), region = 28  ;;  %s410_s4 = sshll.u32 (!%p180_p3), %s765_s3, 3 }
  0x20   : > { %s186_s5 = scalar_lea.sflag (!%p180_p3), [#allocation3], %s765_s3  ;;  %s189_s7 = scalar_lea.vmem (!%p180_p3), [#allocation2], %s410_s4 }
  0x24   : > { %623 = dma.done.wait (%p722_p8), %s186_s5, 128  }
  0x25   : > { %625 = vsyncadd (%p722_p8), %s186_s5, 4294967168  ;;  %s196_s25 = scalar_lea.sflag [#allocation6], %s765_s3  ;;  %s199_s26 = scalar_lea.vmem [#allocation5], %s410_s4 }
  0x26   : > { %627 = dma.done.wait (%p722_p8), %s196_s25, 128  }
  0x27   : > { %629 = vsyncadd (%p722_p8), %s196_s25, 4294967168  ;;  %v226_v0 = vld [vmem:[%s189_s7] sm:$0x3]  ;;  %v227_v1 = vld [vmem:[%s199_s26] sm:$0x3]  ;;  %s412_s21 = sshll.u32 %s765_s3, 1 }
  0x28   : > { %v413_v2 = vld [vmem:[%s189_s7 + $0x2] sm:$0x3]  ;;  %v228_v3 = vadd.f32 1e-10, %v227_v1  ;;  %v231_v4 = vadd.f32 1e-10, %v226_v0 }
  0x29   : > { %v414_v5 = vld [vmem:[%s199_s26 + $0x2] sm:$0x3]  ;;  %v243_v7 = vadd.f32 1e-10, %v413_v2  ;;  %v415_v8 = vld [vmem:[%s189_s7 + $0x4] sm:$0x3] }
  0x2a   : > { %v240_v6 = vadd.f32 1e-10, %v414_v5  ;;  %494 = vlog2.f32 %v228_v3  ;;  %v416_v9 = vld [vmem:[%s199_s26 + $0x4] sm:$0x3]  ;;  %v417_v10 = vld [vmem:[%s189_s7 + $0x6] sm:$0x3] }
  0x2b   : > { %496 = vlog2.f32 %v231_v4  ;;  %v253_v11 = vadd.f32 1e-10, %v416_v9  ;;  %v256_v12 = vadd.f32 1e-10, %v415_v8  ;;  %v418_v13 = vld [vmem:[%s199_s26 + $0x6] sm:$0x3] }
  0x2c   : > { %498 = vlog2.f32 %v240_v6  ;;  %v266_v14 = vadd.f32 1e-10, %v418_v13  ;;  %v269_v15 = vadd.f32 1e-10, %v417_v10  ;;  %s420_s27 = sshll.u32 %s648_s12, 1  ;;  %s225_s16 = scalar_lea.vmem [#allocation7], %s412_s21 }
  0x2d   : > { %500 = vlog2.f32 %v243_v7  ;;  %s288_s15 = scalar_lea.hbm %s819_s2, %s420_s27  ;;  %s290_s12 = sshll.u32 %s225_s16, 4  ;;  %s291_s12 = int_to_ptr.vmem [resolvable:$true] %s290_s12 }
  0x2e   : > { %502 = vlog2.f32 %v253_v11  ;;  %s292_s18 = sshll.u32 %s288_s15, 4  ;;  %s277_s20 = scalar_lea.sflag [#allocation4], %s765_s3  ;;  %s293_s18 = int_to_ptr.hbm [resolvable:$true] %s292_s18 }
  0x2f   : > { %504 = vlog2.f32 %v256_v12  ;;  %s584_s28 = sshra.s32 %s293_s18, 4  ;;  %s590_s4 = scalar_lea.hbm %s819_s2, 4  ;;  %s585_s28 = int_to_ptr.hbm [resolvable:$true] %s584_s28 }
  0x30   : > { %v495_v16 = vpop.eup %494  ;;  %506 = vlog2.f32 %v266_v14  ;;  %s586_s19 = scalar_lea.hbm %s585_s28, 2  ;;  %p591_p7 = scmp.lt.s32.totalorder %s585_s28, %s819_s2 }
  0x31   : > { %v497_v17 = vpop.eup %496  ;;  %v230_v18 = vmul.f32 0.6931472, %v495_v16  ;;  %508 = vlog2.f32 %v269_v15  ;;  %p587_p4 = scmp.ne.s32.totalorder %s585_s28, %s586_s19  ;;  %p592_p8 = scmp.lt.s32.totalorder %s590_s4, %s586_s19 }
  0x32   : > { %v499_v19 = vpop.eup %498  ;;  %v233_v20 = vmul.f32 0.6931472, %v497_v17 }
  0x33   : > { %v501_v21 = vpop.eup %500  ;;  %v242_v22 = vmul.f32 0.6931472, %v499_v19  ;;  %p588_p5 = pnand %p587_p4, %p726_p9  ;;  %p593_p10 = por %p592_p8, %p591_p7 }
  0x34   : > { %v503_v23 = vpop.eup %502  ;;  %v234_v24 = vsub.f32 %v230_v18, %v233_v20  ;;  %v245_v25 = vmul.f32 0.6931472, %v501_v21 }
  0x35   : > { %v505_v26 = vpop.eup %504  ;;  %v255_v27 = vmul.f32 0.6931472, %v503_v23  ;;  %p589_p6 = pneg %p588_p5 }
  0x36   : > { %v507_v28 = vpop.eup %506  ;;  %v235_v29 = vmul.f32 %v234_v24, %v227_v1  ;;  %v246_v30 = vsub.f32 %v242_v22, %v245_v25  ;;  %v258_v31 = vmul.f32 0.6931472, %v505_v26 }
  0x37   : > { %v509_v32 = vpop.eup %508  ;;  %v268_v33 = vmul.f32 0.6931472, %v507_v28  ;;  %p594_p13 = pnand %p593_p10, %p589_p6 }
  0x38   : > { %v247_v34 = vmul.f32 %v414_v5, %v246_v30  ;;  %v259_v35 = vsub.f32 %v255_v27, %v258_v31  ;;  %v271_v36 = vmul.f32 0.6931472, %v509_v32 }
  0x3a   : > { %v248_v37 = vadd.f32 %v247_v34, %v235_v29  ;;  %v260_v38 = vmul.f32 %v416_v9, %v259_v35  ;;  %v272_v39 = vsub.f32 %v268_v33, %v271_v36 }
  0x3c   : > { %v261_v40 = vadd.f32 %v260_v38, %v248_v37  ;;  %v273_v41 = vmul.f32 %v418_v13, %v272_v39 }
  0x3e   : > { %v274_v42 = vadd.f32 %v273_v41, %v261_v40 }
  0x40   : > { %275 = vst [vmem:[%s225_s16] sm:$0x3] %v274_v42 }
  0x41   : > { %597 = shalt.err (!%p594_p13)
}
  0x42   : > { %429 = dma.vmem_to_hbm [thread:$0]  (%p726_p9), %s291_s12, 32, %s293_s18, %s277_s20  }
  0x43 PF: > { %s304_s3 = sand.u32 1, %s636_s9   ;;  %p439_p0 = pnand %p402_p12, %p733_p11 }
  0x44   : > { %s305_s25 = scalar_lea.sflag [#allocation4], %s304_s3 }
  0x45   : > { %p440_p1 = pneg %p439_p0 }
  0x47   : > { %631 = dma.done.wait (%p440_p1), %s305_s25, 32  }
  0x48   : > { %633 = vsyncadd (%p440_p1), %s305_s25, 4294967264  ;;  %s21_s14 = sadd.s32 1, %s656_s14   ;;  %s825_s9 = smov %s640_s10 }
  0x49   : > { %p18_p2 = scmp.ge.s32.totalorder %s21_s14, 4   ;;  %s826_s10 = smov %s644_s11 }
  0x4a   : > { %s827_s11 = smov %s731_s23  ;;  %s828_s12 = smov %s652_s13 }
  0x4b   : > { %s829_s13 = smov %s831_s17  ;;  %20 = sbr.rel (!%p18_p2) target bundleno = 8 (0x8), region = 92 }
  0x50   :  { %311 = vsyncpa [#allocation3], 1 }
  0x51   :  { %313 = vsyncpa [#allocation3 + $0x1], 1 }
  0x52   :  { %314 = vsyncpa [#allocation6], 1 }
  0x53   :  { %316 = vsyncpa [#allocation6 + $0x1], 1 }
  0x54   :  { %317 = vsyncpa [#allocation4], 1 }
  0x55   :  { %319 = vsyncpa [#allocation4 + $0x1], 1 }

</bundles_post_ra>
